<compile_context>
chip_gen: v6e
topology: v6e:2x2x1
jax: 0.10.0
libtpu: 0.0.40
codegen_flags: <defaults>
</compile_context>

<pallas_src>
import jax
import jax.numpy as jnp
from jax.experimental import pallas as pl
from jax.experimental.pallas import tpu as pltpu

LANE = 128
MIN_TM = 512    # rows: below this keep a single block (per-step overhead dominates)
MAX_TM = 2048   # rows: 1 MiB f32 per input buffer -> per-step overhead < 10%


def _round_up(x, k):
    return ((x + k - 1) // k) * k


def _num_tensorcores():
    """Best-effort TensorCore count (2 on v7x, 1 on v5e/v6e). Safe fallback: 2."""
    try:
        info = pltpu.get_tpu_info()
        for name in ("num_cores", "core_count", "num_tensorcores", "tensorcore_count"):
            v = getattr(info, name, None)
            if isinstance(v, int) and 1 <= v <= 8:
                return v
    except Exception:
        pass
    # A size-2 "parallel" leading axis is near-free on single-TC chips.
    return 2


def _make_kernel(tile_rows, steps_per_slice, num_full_blocks, tail_rem, has_tail):
    """Reduction kernel for a fixed (static) problem geometry.

    Output block (1, 4, 8, LANE) accumulates, per slice:
      [0] sum(sigmoid(pred) * label)     [1] sum(sigmoid(pred))
      [2] sum(label)                     [3] sum(sigmoid(pred) * distance_map)
    """
    assert tile_rows % 8 == 0

    def tile_sum(v):
        # (tile_rows, LANE) -> (8, LANE): pure vreg-add tree on the VPU (no XLU);
        # the remaining cross-lane/sublane reduction is deferred to the wrapper.
        return v.reshape(tile_rows // 8, 8, LANE).sum(axis=0)

    def kernel(pred_ref, label_ref, dmap_ref, out_ref):
        c = pl.program_id(0)
        i = pl.program_id(1)

        @pl.when(i == 0)
        def _():
            out_ref[...] = jnp.zeros_like(out_ref)

        x = pred_ref[...].astype(jnp.float32)
        # sigmoid via a single EUP tanh (cheaper than exp + divide)
        p = 0.5 * jnp.tanh(0.5 * x) + 0.5
        lbl = label_ref[...].astype(jnp.float32)
        dm = dmap_ref[...].astype(jnp.float32)

        def accumulate(pv, lv, dv):
            out_ref[0, 0] += tile_sum(pv * lv)   # intersect
            out_ref[0, 1] += tile_sum(pv)        # sum(sigmoid(pred))
            out_ref[0, 2] += tile_sum(lv)        # sum(label)
            out_ref[0, 3] += tile_sum(pv * dv)   # sum(sigmoid(pred) * dmap)

        if not has_tail:
            # Fast path: every block is full and every grid step is valid.
            accumulate(p, lbl, dm)
        else:
            # Unclamped logical block index (the index_map clamps separately so
            # excess grid steps re-read a valid block but contribute nothing).
            blk = c * steps_per_slice + i

            @pl.when(blk < num_full_blocks)
            def _():
                accumulate(p, lbl, dm)

            @pl.when(blk == num_full_blocks)
            def _():
                # Partial tail block: only `tail_rem` (static) leading elements of
                # this tile are real data; mask the rest.  Local index only -- no
                # global-index int32 overflow for huge inputs.
                row = jax.lax.broadcasted_iota(jnp.int32, (tile_rows, LANE), 0)
                col = jax.lax.broadcasted_iota(jnp.int32, (tile_rows, LANE), 1)
                mask = row * LANE + col < tail_rem
                zero = jnp.zeros_like(p)
                pm = jnp.where(mask, p, zero)
                lm = jnp.where(mask, lbl, zero)
                # Keep the dmap select too (tail step only): the padded region of
                # the tile can hold non-finite stale VMEM bits, and 0 * NaN = NaN.
                dmm = jnp.where(mask, dm, zero)
                accumulate(pm, lm, dmm)

    return kernel


def hybridloss_ds_forward(predicted_output, label, distance_map, alpha):
    """Matches hybridloss_ds.forward: returns (error, alpha*error + (1-alpha)*surface)."""
    assert predicted_output.shape == label.shape == distance_map.shape
    n = predicted_output.size
    assert n > 0

    # Sublane multiple required by the narrowest input dtype (f32->8, bf16->16, int8->32).
    mult = max(
        max(32 // a.dtype.itemsize for a in (predicted_output, label, distance_map)), 8)

    m_exact = pl.cdiv(n, LANE)          # rows of 128 lanes needed
    if m_exact <= MIN_TM:
        # Small input: single block; round rows up to the sublane multiple so the
        # accumulator tree is always the dense (..,8,128) VPU path.
        m_rows = _round_up(m_exact, mult)
        tile_rows = m_rows
    else:
        # Prefer >= 4 blocks (2 parallel slices x >= 2 pipelined steps) on large
        # inputs, but never below MIN_TM nor above MAX_TM rows per tile.
        m_rows = m_exact
        tile_rows = min(max(_round_up(pl.cdiv(m_rows, 4), mult), MIN_TM), MAX_TM)

    pad = m_rows * LANE - n

    def to_rows(x):
        flat = x.reshape(-1)
        if pad:
            # Only for ragged/tiny inputs; padded elements are masked in-kernel,
            # so the pad value is irrelevant.  No dtype upcast here (bandwidth).
            flat = jnp.pad(flat, (0, pad))
        return flat.reshape(m_rows, LANE)

    pred2 = to_rows(predicted_output)
    label2 = to_rows(label)
    dmap2 = to_rows(distance_map)

    tile_elems = tile_rows * LANE
    num_blocks = pl.cdiv(m_rows, tile_rows)
    num_full_blocks = n // tile_elems
    tail_rem = n - num_full_blocks * tile_elems

    num_tc = _num_tensorcores()
    num_slices = num_tc if num_blocks >= num_tc else 1
    steps_per_slice = pl.cdiv(num_blocks, num_slices)
    need_clamp = num_slices * steps_per_slice != num_blocks
    has_tail = (tail_rem != 0) or need_clamp

    def in_map(c, i):
        blk = c * steps_per_slice + i
        if need_clamp:
            # Excess grid steps re-read the last valid block; the kernel skips
            # (or fully masks) their contribution.
            blk = jnp.minimum(blk, num_blocks - 1)
        return (blk, 0)

    kernel = _make_kernel(tile_rows, steps_per_slice, num_full_blocks, tail_rem, has_tail)

    # TODO(synk): on v7x, sweep pipeline_mode=pl.Buffered(3) on the input specs.
    partials = pl.pallas_call(
        kernel,
        out_shape=jax.ShapeDtypeStruct((num_slices, 4, 8, LANE), jnp.float32),
        grid=(num_slices, steps_per_slice),
        in_specs=[
            pl.BlockSpec((tile_rows, LANE), in_map),
            pl.BlockSpec((tile_rows, LANE), in_map),
            pl.BlockSpec((tile_rows, LANE), in_map),
        ],
        out_specs=pl.BlockSpec((1, 4, 8, LANE), lambda c, i: (c, 0, 0, 0)),
        compiler_params=pltpu.CompilerParams(
            dimension_semantics=("parallel", "arbitrary"),
            vmem_limit_bytes=32 * 1024 * 1024),
    )(pred2, label2, dmap2)

    # Final (tiny) cross-slice / cross-sublane / cross-lane reduction.
    sums = jnp.sum(partials, axis=(0, 2, 3))          # (4,)
    intersect, pred_sum, label_sum, surf_sum = sums[0], sums[1], sums[2], sums[3]

    # dice loss (torch: view(1,-1).sum(-1) -> shape (1,)); clamp matches .clamp(min=1e-6)
    denominator = jnp.maximum(pred_sum + label_sum, 1e-6)
    dice_score = 2.0 * (intersect / denominator)
    error = (1.0 - dice_score).reshape(1)

    # surface loss = mean(sigmoid(pred) * distance_map) over the ORIGINAL n
    surface_loss = surf_sum / jnp.float32(n)

    dsc = alpha * error
    surface = (1.0 - alpha) * surface_loss
    return error, dsc + surface


def _reference(predicted_output, label, distance_map, alpha):
    p = jax.nn.sigmoid(predicted_output.astype(jnp.float32)).reshape(1, -1)
    l = label.astype(jnp.float32).reshape(1, -1)
    intersect = (p * l).sum(-1)
    denom = jnp.maximum(p.sum(-1) + l.sum(-1), 1e-6)
    error = 1.0 - 2.0 * intersect / denom
    surf = (jax.nn.sigmoid(predicted_output.astype(jnp.float32))
            * distance_map.astype(jnp.float32)).mean()
    return error, alpha * error + (1.0 - alpha) * surf


def _check(shape, key, alpha):
    k1, k2, k3 = jax.random.split(key, 3)
    pred = jax.random.normal(k1, shape, dtype=jnp.float32)
    lbl = (jax.random.uniform(k2, shape) > 0.5).astype(jnp.float32)
    # synthetic signed distance map (integer-valued, like distance_transform_edt)
    dmap = jnp.round(
        jax.random.uniform(k3, shape, minval=-5.0, maxval=5.0)).astype(jnp.float32)

    error, total = hybridloss_ds_forward(pred, lbl, dmap, alpha)
    jax.block_until_ready((error, total))
    ref_e, ref_t = _reference(pred, lbl, dmap, alpha)
    assert jnp.allclose(error, ref_e, atol=1e-4, rtol=1e-4), (shape, error, ref_e)
    assert jnp.allclose(total, ref_t, atol=1e-4, rtol=1e-4), (shape, total, ref_t)


if __name__ == "__main__":
    key = jax.random.PRNGKey(0)
    k0, k1, k2 = jax.random.split(key, 3)
    alpha = jnp.float32(0.7)

    # primary NCHW example (lane-aligned fast path: no pad, no tail branch)
    _check((2, 4, 16, 16), k0, alpha)
    # ragged shape: exercises the pl.when-gated tail mask (n % 128 != 0)
    _check((2, 3, 15, 17), k1, alpha)
    # multi-block path: 2-slice "parallel" core axis + clamped excess step
    _check((2, 4, 128, 192), k2, alpha)

    print("KERNEL_OK")
</pallas_src>

<mosaic_0001>
module attributes {stable_mosaic.version = 11 : i64} {
  func.func @kernel(%arg0: i32, %arg1: i32, %arg2: memref<16x128xf32, #tpu.memory_space<vmem>>, %arg3: memref<16x128xf32, #tpu.memory_space<vmem>>, %arg4: memref<16x128xf32, #tpu.memory_space<vmem>>, %arg5: memref<1x4x8x128xf32, #tpu.memory_space<vmem>>) attributes {dimension_semantics = [#tpu.dimension_semantics<parallel>, #tpu.dimension_semantics<arbitrary>], iteration_bounds = array<i64: 1, 1>, scalar_prefetch = 0 : i64, scratch_operands = 0 : i64, tpu.core_type = #tpu.core_type<tc>, window_params = [{transform_indices = @transform_0, window_bounds = array<i64: 16, 128>}, {transform_indices = @transform_1, window_bounds = array<i64: 16, 128>}, {transform_indices = @transform_2, window_bounds = array<i64: 16, 128>}, {transform_indices = @transform_3, window_bounds = array<i64: 1, 4, 8, 128>}]} {
    %c0_i32 = arith.constant 0 : i32
    %0 = arith.cmpi eq, %arg1, %c0_i32 : i32
    %1 = arith.extui %0 : i1 to i32
    %c0_i32_0 = arith.constant 0 : i32
    %2 = arith.cmpi ne, %1, %c0_i32_0 : i32
    scf.if %2 {
      %cst_41 = arith.constant 0.000000e+00 : f32
      %47 = vector.broadcast %cst_41 : f32 to vector<1x4x8x128xf32>
      %c0_42 = arith.constant 0 : index
      %c0_43 = arith.constant 0 : index
      %c0_44 = arith.constant 0 : index
      %c0_45 = arith.constant 0 : index
      %48 = vector.load %arg5[%c0_42, %c0_43, %c0_44, %c0_45] : memref<1x4x8x128xf32, #tpu.memory_space<vmem>>, vector<1x4x8x128xf32>
      tpu.vector_store %arg5[%c0_42, %c0_43, %c0_44, %c0_45], %47 {strides = array<i32>} : memref<1x4x8x128xf32, #tpu.memory_space<vmem>>, vector<1x4x8x128xf32>,
    } else {
    }
    %c0 = arith.constant 0 : index
    %c0_1 = arith.constant 0 : index
    %3 = vector.load %arg2[%c0, %c0_1] : memref<16x128xf32, #tpu.memory_space<vmem>>, vector<16x128xf32>
    %cst = arith.constant 5.000000e-01 : f32
    %4 = vector.broadcast %cst : f32 to vector<16x128xf32>
    %5 = arith.mulf %4, %3 : vector<16x128xf32>
    %6 = math.tanh %5 : vector<16x128xf32>
    %cst_2 = arith.constant 5.000000e-01 : f32
    %7 = vector.broadcast %cst_2 : f32 to vector<16x128xf32>
    %8 = arith.mulf %7, %6 : vector<16x128xf32>
    %cst_3 = arith.constant 5.000000e-01 : f32
    %9 = vector.broadcast %cst_3 : f32 to vector<16x128xf32>
    %10 = arith.addf %8, %9 : vector<16x128xf32>
    %c0_4 = arith.constant 0 : index
    %c0_5 = arith.constant 0 : index
    %11 = vector.load %arg3[%c0_4, %c0_5] : memref<16x128xf32, #tpu.memory_space<vmem>>, vector<16x128xf32>
    %c0_6 = arith.constant 0 : index
    %c0_7 = arith.constant 0 : index
    %12 = vector.load %arg4[%c0_6, %c0_7] : memref<16x128xf32, #tpu.memory_space<vmem>>, vector<16x128xf32>
    %c0_8 = arith.constant 0 : index
    %c0_9 = arith.constant 0 : index
    %c0_10 = arith.constant 0 : index
    %c0_11 = arith.constant 0 : index
    %13 = vector.load %arg5[%c0_8, %c0_9, %c0_10, %c0_11] : memref<1x4x8x128xf32, #tpu.memory_space<vmem>>, vector<1x1x8x128xf32>
    %14 = vector.shape_cast %13 : vector<1x1x8x128xf32> to vector<8x128xf32>
    %15 = arith.mulf %10, %11 : vector<16x128xf32>
    %16 = vector.shape_cast %15 : vector<16x128xf32> to vector<2x8x128xf32>
    %cst_12 = arith.constant dense<0.000000e+00> : vector<8x128xf32>
    %17 = vector.multi_reduction <add>, %16, %cst_12 [0] : vector<2x8x128xf32> to vector<8x128xf32>
    %18 = arith.addf %14, %17 : vector<8x128xf32>
    %c0_13 = arith.constant 0 : index
    %c0_14 = arith.constant 0 : index
    %c0_15 = arith.constant 0 : index
    %c0_16 = arith.constant 0 : index
    %19 = vector.load %arg5[%c0_13, %c0_14, %c0_15, %c0_16] : memref<1x4x8x128xf32, #tpu.memory_space<vmem>>, vector<1x1x8x128xf32>
    %20 = vector.shape_cast %19 : vector<1x1x8x128xf32> to vector<8x128xf32>
    %21 = vector.shape_cast %18 : vector<8x128xf32> to vector<1x1x8x128xf32>
    tpu.vector_store %arg5[%c0_13, %c0_14, %c0_15, %c0_16], %21 {strides = array<i32>} : memref<1x4x8x128xf32, #tpu.memory_space<vmem>>, vector<1x1x8x128xf32>,
    %c0_17 = arith.constant 0 : index
    %c1 = arith.constant 1 : index
    %c0_18 = arith.constant 0 : index
    %c0_19 = arith.constant 0 : index
    %22 = vector.load %arg5[%c0_17, %c1, %c0_18, %c0_19] : memref<1x4x8x128xf32, #tpu.memory_space<vmem>>, vector<1x1x8x128xf32>
    %23 = vector.shape_cast %22 : vector<1x1x8x128xf32> to vector<8x128xf32>
    %24 = vector.shape_cast %10 : vector<16x128xf32> to vector<2x8x128xf32>
    %cst_20 = arith.constant dense<0.000000e+00> : vector<8x128xf32>
    %25 = vector.multi_reduction <add>, %24, %cst_20 [0] : vector<2x8x128xf32> to vector<8x128xf32>
    %26 = arith.addf %23, %25 : vector<8x128xf32>
    %c0_21 = arith.constant 0 : index
    %c1_22 = arith.constant 1 : index
    %c0_23 = arith.constant 0 : index
    %c0_24 = arith.constant 0 : index
    %27 = vector.load %arg5[%c0_21, %c1_22, %c0_23, %c0_24] : memref<1x4x8x128xf32, #tpu.memory_space<vmem>>, vector<1x1x8x128xf32>
    %28 = vector.shape_cast %27 : vector<1x1x8x128xf32> to vector<8x128xf32>
    %29 = vector.shape_cast %26 : vector<8x128xf32> to vector<1x1x8x128xf32>
    tpu.vector_store %arg5[%c0_21, %c1_22, %c0_23, %c0_24], %29 {strides = array<i32>} : memref<1x4x8x128xf32, #tpu.memory_space<vmem>>, vector<1x1x8x128xf32>,
    %c0_25 = arith.constant 0 : index
    %c2 = arith.constant 2 : index
    %c0_26 = arith.constant 0 : index
    %c0_27 = arith.constant 0 : index
    %30 = vector.load %arg5[%c0_25, %c2, %c0_26, %c0_27] : memref<1x4x8x128xf32, #tpu.memory_space<vmem>>, vector<1x1x8x128xf32>
    %31 = vector.shape_cast %30 : vector<1x1x8x128xf32> to vector<8x128xf32>
    %32 = vector.shape_cast %11 : vector<16x128xf32> to vector<2x8x128xf32>
    %cst_28 = arith.constant dense<0.000000e+00> : vector<8x128xf32>
    %33 = vector.multi_reduction <add>, %32, %cst_28 [0] : vector<2x8x128xf32> to vector<8x128xf32>
    %34 = arith.addf %31, %33 : vector<8x128xf32>
    %c0_29 = arith.constant 0 : index
    %c2_30 = arith.constant 2 : index
    %c0_31 = arith.constant 0 : index
    %c0_32 = arith.constant 0 : index
    %35 = vector.load %arg5[%c0_29, %c2_30, %c0_31, %c0_32] : memref<1x4x8x128xf32, #tpu.memory_space<vmem>>, vector<1x1x8x128xf32>
    %36 = vector.shape_cast %35 : vector<1x1x8x128xf32> to vector<8x128xf32>
    %37 = vector.shape_cast %34 : vector<8x128xf32> to vector<1x1x8x128xf32>
    tpu.vector_store %arg5[%c0_29, %c2_30, %c0_31, %c0_32], %37 {strides = array<i32>} : memref<1x4x8x128xf32, #tpu.memory_space<vmem>>, vector<1x1x8x128xf32>,
    %c0_33 = arith.constant 0 : index
    %c3 = arith.constant 3 : index
    %c0_34 = arith.constant 0 : index
    %c0_35 = arith.constant 0 : index
    %38 = vector.load %arg5[%c0_33, %c3, %c0_34, %c0_35] : memref<1x4x8x128xf32, #tpu.memory_space<vmem>>, vector<1x1x8x128xf32>
    %39 = vector.shape_cast %38 : vector<1x1x8x128xf32> to vector<8x128xf32>
    %40 = arith.mulf %10, %12 : vector<16x128xf32>
    %41 = vector.shape_cast %40 : vector<16x128xf32> to vector<2x8x128xf32>
    %cst_36 = arith.constant dense<0.000000e+00> : vector<8x128xf32>
    %42 = vector.multi_reduction <add>, %41, %cst_36 [0] : vector<2x8x128xf32> to vector<8x128xf32>
    %43 = arith.addf %39, %42 : vector<8x128xf32>
    %c0_37 = arith.constant 0 : index
    %c3_38 = arith.constant 3 : index
    %c0_39 = arith.constant 0 : index
    %c0_40 = arith.constant 0 : index
    %44 = vector.load %arg5[%c0_37, %c3_38, %c0_39, %c0_40] : memref<1x4x8x128xf32, #tpu.memory_space<vmem>>, vector<1x1x8x128xf32>
    %45 = vector.shape_cast %44 : vector<1x1x8x128xf32> to vector<8x128xf32>
    %46 = vector.shape_cast %43 : vector<8x128xf32> to vector<1x1x8x128xf32>
    tpu.vector_store %arg5[%c0_37, %c3_38, %c0_39, %c0_40], %46 {strides = array<i32>} : memref<1x4x8x128xf32, #tpu.memory_space<vmem>>, vector<1x1x8x128xf32>,
    return
  }
  func.func @transform_0(%arg0: i32, %arg1: i32) -> (i32, i32) {
    %c1_i32 = arith.constant 1 : i32
    %0 = arith.muli %arg0, %c1_i32 : i32
    %1 = arith.addi %0, %arg1 : i32
    %c0_i32 = arith.constant 0 : i32
    %c0_i32_0 = arith.constant 0 : i32
    return %1, %c0_i32 : i32, i32
  }
  func.func @transform_1(%arg0: i32, %arg1: i32) -> (i32, i32) {
    %c1_i32 = arith.constant 1 : i32
    %0 = arith.muli %arg0, %c1_i32 : i32
    %1 = arith.addi %0, %arg1 : i32
    %c0_i32 = arith.constant 0 : i32
    %c0_i32_0 = arith.constant 0 : i32
    return %1, %c0_i32 : i32, i32
  }
  func.func @transform_2(%arg0: i32, %arg1: i32) -> (i32, i32) {
    %c1_i32 = arith.constant 1 : i32
    %0 = arith.muli %arg0, %c1_i32 : i32
    %1 = arith.addi %0, %arg1 : i32
    %c0_i32 = arith.constant 0 : i32
    %c0_i32_0 = arith.constant 0 : i32
    return %1, %c0_i32 : i32, i32
  }
  func.func @transform_3(%arg0: i32, %arg1: i32) -> (i32, i32, i32, i32) {
    %c0_i32 = arith.constant 0 : i32
    %c0_i32_0 = arith.constant 0 : i32
    %c0_i32_1 = arith.constant 0 : i32
    %c0_i32_2 = arith.constant 0 : i32
    return %arg0, %c0_i32, %c0_i32_0, %c0_i32_1 : i32, i32, i32, i32
  }
}

</mosaic_0001>

<bundles_post_ra>
// kernel: tpu_custom_call.1
= control target key start
LH: loop header
LB: loop body
LE: loop exit
PB: predicated region body
PF: predicated region fallthrough
CT: control target
= control target key end

     0   :  { %8 = vsyncpa [#allocation3], 0  ;;  %s284_s0 = inlined_call_operand.hbm [shape: f32[16,128], index: 0, kind: input, shape index: {}]   ;;  %s285_s1 = inlined_call_operand.hbm [shape: f32[16,128], index: 1, kind: input, shape index: {}]   ;;  %s286_s2 = inlined_call_operand.hbm [shape: f32[16,128], index: 2, kind: input, shape index: {}]   ;;  %s287_s3 = inlined_call_operand.hbm [shape: f32[1,4,8,128], index: 3, kind: output, shape index: {}]  }
   0x1   :  { %9 = vsyncpa [#allocation6], 0 }
   0x2   :  { %10 = vsyncpa [#allocation4], 0  ;;  %s234_s12 = smov [#allocation5]   ;;  %s235_s14 = smov [#allocation2]  }
   0x3   :  { %s36_s13 = sshll.u32 %s234_s12, 4  ;;  %s20_s15 = sshll.u32 %s235_s14, 4  ;;  %s37_s13 = int_to_ptr.vmem [resolvable:$true] %s36_s13  ;;  %s21_s15 = int_to_ptr.vmem [resolvable:$true] %s20_s15 }
   0x4   :  { %s156_s16 = scalar_lea.vmem %s37_s13, 256  ;;  %p161_p1 = scmp.lt.s32.totalorder %s37_s13, %s37_s13 }
   0x5   :  { %p157_p0 = scmp.ne.s32.totalorder %s37_s13, %s156_s16  ;;  %p162_p2 = scmp.lt.s32.totalorder %s156_s16, %s156_s16 }
   0x7   :  { %p163_p3 = por %p162_p2, %p161_p1 }
   0x9   :  { %p164_p4 = pnand %p163_p3, %p157_p0 }
   0xb   :  { %167 = shalt.err (!%p164_p4)
}
   0xc   :  { %s236_s17 = smov 128   ;;  %s237_s18 = smov 8  }
   0xd   :  { %42 = dma.hbm_to_vmem [thread:$0]  %s285_s1, 256, %s37_s13, [#allocation6], %s236_s17, %s236_s17, %s237_s18  }
   0xe   :  { %s176_s21 = scalar_lea.vmem %s21_s15, 256  ;;  %p181_p6 = scmp.lt.s32.totalorder %s21_s15, %s21_s15 }
   0xf   :  { %p177_p5 = scmp.ne.s32.totalorder %s21_s15, %s176_s21  ;;  %p182_p7 = scmp.lt.s32.totalorder %s176_s21, %s176_s21 }
  0x11   :  { %p183_p8 = por %p182_p7, %p181_p6 }
  0x13   :  { %p184_p9 = pnand %p183_p8, %p177_p5 }
  0x15   :  { %187 = shalt.err (!%p184_p9)
}
  0x16   :  { %26 = dma.hbm_to_vmem [thread:$0]  %s284_s0, 256, %s21_s15, [#allocation3], %s236_s17, %s236_s17, %s237_s18  }
  0x17   :  { %s238_s24 = smov [#allocation7]  }
  0x18   :  { %s52_s25 = sshll.u32 %s238_s24, 4  ;;  %s53_s25 = int_to_ptr.vmem [resolvable:$true] %s52_s25 }
  0x19   :  { %s196_s26 = scalar_lea.vmem %s53_s25, 256  ;;  %p201_p11 = scmp.lt.s32.totalorder %s53_s25, %s53_s25 }
  0x1a   :  { %p197_p10 = scmp.ne.s32.totalorder %s53_s25, %s196_s26  ;;  %p202_p12 = scmp.lt.s32.totalorder %s196_s26, %s196_s26 }
  0x1c   :  { %p203_p13 = por %p202_p12, %p201_p11 }
  0x1e   :  { %p204_p0 = pnand %p203_p13, %p197_p10 }
  0x20   :  { %207 = shalt.err (!%p204_p0)
}
  0x21   :  { %58 = dma.hbm_to_vmem [thread:$0]  %s286_s2, 256, %s53_s25, [#allocation6], %s236_s17, %s236_s17, %s237_s18  }
  0x22   :  { %228 = dma.done.wait [#allocation3], 256  }
  0x23   :  { %229 = vsyncadd [#allocation3], 4294967040 }
  0x24   :  { %230 = dma.done.wait [#allocation6], 512  }
  0x25   :  { %231 = vsyncadd [#allocation6], 4294966784  ;;  %v82_v0 = vld [vmem:[#allocation2] sm:$0xff]  ;;  %v83_v1 = vld [vmem:[#allocation2 + $0x8] sm:$0xff]  ;;  %s239_s0 = smov [#allocation8]  }
  0x26   :  { %v84_v2 = vmul.f32 0.5, %v82_v0  ;;  %v85_v3 = vmul.f32 0.5, %v83_v1  ;;  %v92_v4 = vld [vmem:[#allocation5] sm:$0xff]  ;;  %v93_v5 = vld [vmem:[#allocation5 + $0x8] sm:$0xff]  ;;  %v94_v11 = vld [vmem:[#allocation7] sm:$0xff]  ;;  %s124_s2 = sshll.u32 %s239_s0, 4  ;;  %s125_s2 = int_to_ptr.vmem [resolvable:$true] %s124_s2 }
  0x27   :  { %v109_v6 = vadd.f32 %v93_v5, %v92_v4  ;;  %v95_v13 = vld [vmem:[#allocation7 + $0x8] sm:$0xff]  ;;  %s208_s28 = scalar_lea.vmem %s125_s2, 512  ;;  %p213_p2 = scmp.lt.s32.totalorder %s125_s2, %s125_s2 }
  0x28   :  { %144 = vtanh.f32 %v84_v2  ;;  %p209_p1 = scmp.ne.s32.totalorder %s125_s2, %s208_s28  ;;  %p214_p3 = scmp.lt.s32.totalorder %s208_s28, %s208_s28 }
  0x29   :  { %146 = vtanh.f32 %v85_v3  ;;  %111 = vst [vmem:[#allocation8 + $0x10] sm:$0xff] %v109_v6 }
  0x2a   :  { %p215_p4 = por %p214_p3, %p213_p2 }
  0x2c   :  { %p216_p5 = pnand %p215_p4, %p209_p1 }
  0x35   :  { %v145_v7 = vpop.eup %144 }
  0x36   :  { %v147_v8 = vpop.eup %146  ;;  %v88_v9 = vmul.f32 0.5, %v145_v7 }
  0x37   :  { %v89_v10 = vmul.f32 0.5, %v147_v8 }
  0x38   :  { %v90_v12 = vadd.f32 0.5, %v88_v9 }
  0x39   :  { %v91_v14 = vadd.f32 0.5, %v89_v10 }
  0x3a   :  { %v97_v15 = vmul.f32 %v92_v4, %v90_v12  ;;  %v114_v16 = vmul.f32 %v94_v11, %v90_v12 }
  0x3b   :  { %v98_v17 = vmul.f32 %v93_v5, %v91_v14  ;;  %v104_v18 = vadd.f32 %v91_v14, %v90_v12  ;;  %v115_v19 = vmul.f32 %v95_v13, %v91_v14 }
  0x3d   :  { %v99_v20 = vadd.f32 %v98_v17, %v97_v15  ;;  %v116_v21 = vadd.f32 %v115_v19, %v114_v16  ;;  %106 = vst [vmem:[#allocation8 + $0x8] sm:$0xff] %v104_v18 }
  0x3f   :  { %101 = vst [vmem:[#allocation8] sm:$0xff] %v99_v20  ;;  %118 = vst [vmem:[#allocation8 + $0x18] sm:$0xff] %v116_v21 }
  0x40   :  { %219 = shalt.err (!%p216_p5)
}
  0x41   :  { %130 = dma.vmem_to_hbm [thread:$0]  %s125_s2, 512, %s287_s3, [#allocation4], %s236_s17, %s236_s17, %s237_s18  }
  0x42   :  { %232 = dma.done.wait [#allocation4], 512  }
  0x43   :  { %233 = vsyncadd [#allocation4], 4294966784 }
  0x44   :  { %134 = vsyncpa [#allocation3], 1 }
  0x45   :  { %135 = vsyncpa [#allocation6], 1 }
  0x46   :  { %136 = vsyncpa [#allocation4], 1 }

</bundles_post_ra>
